<compile_context>
chip_gen: v6e
topology: v6e:2x2x1
jax: 0.10.0
libtpu: 0.0.40
codegen_flags: <defaults>
</compile_context>

<pallas_src>
import jax
import jax.numpy as jnp
from jax.experimental import pallas as pl
from jax.experimental.pallas import tpu as pltpu

_EPS = 1e-12            # torch F.normalize default eps
_EPS_SQ = _EPS * _EPS   # 1e-24, representable in f32


def _rmsnorm_kernel(x_ref, w_ref, o_ref):
    # x_ref: (tile_rows, dim) in input dtype; w_ref: (1, dim) f32 = (gamma+1)*sqrt(dim)
    x = x_ref[...].astype(jnp.float32)
    w = w_ref[...]                                     # (1, dim) f32, broadcasts over rows

    sq_sum = jnp.sum(x * x, axis=-1, keepdims=True)    # (tile_rows, 1)
    inv = jax.lax.rsqrt(jnp.maximum(sq_sum, _EPS_SQ))  # == 1 / max(||x||, eps)

    o_ref[...] = ((x * inv) * w).astype(o_ref.dtype)


def _vmem_capacity_bytes():
    """Physical VMEM per TensorCore; conservative fallback if query fails."""
    try:
        info = pltpu.get_tpu_info()
        cap = getattr(info, "vmem_capacity_bytes", None)
        if cap:
            return int(cap)
    except Exception:
        pass
    return 64 * 1024 * 1024  # v7x per-TC size (smallest current generation)


def _derive_tiling(rows, dim, dtype_bytes, vmem_cap):
    """Pick tile_rows from a VMEM byte budget; prefer an even, multiple-of-8 split."""
    # Per-row VMEM cost of one pipelined block:
    #   input block + output block, double-buffered (x2 each), in native dtype,
    #   plus ~2 full-tile f32 intermediates used by the compute.
    bytes_per_row = 4 * dim * dtype_bytes + 2 * dim * 4
    budget = int(vmem_cap * 0.55)  # headroom for gamma, sems, compiler scratch

    tile_rows = max(8, (budget // max(bytes_per_row, 1)) // 8 * 8)

    if tile_rows >= rows:
        # Whole thing fits in one block.  For large row counts still split in
        # two so both TensorCores (v7x megacore) get work.
        if rows >= 2048:
            tile_rows = ((-(-rows // 2) + 7) // 8) * 8
            return tile_rows, -(-rows // tile_rows)
        return rows, 1  # block == full array dim, (8,128) rule doesn't apply

    # Rebalance to an even split so the last block isn't heavily partial, and
    # prefer an even number of grid steps for megacore sharding.
    nsteps = -(-rows // tile_rows)
    if nsteps % 2 == 1 and nsteps > 1:
        nsteps += 1
    tile_rows = ((-(-rows // nsteps) + 7) // 8) * 8
    return tile_rows, -(-rows // tile_rows)


def rmsnorm(x, gamma):
    """RMSNorm forward. x: (..., dim), gamma: (dim,)."""
    dim = x.shape[-1]
    scale = float(dim) ** 0.5

    lead_shape = x.shape[:-1]
    rows = 1
    for s in lead_shape:
        rows *= s
    x2 = x.reshape(rows, dim)

    # Fold scale into gamma once in the wrapper: O(dim), amortized over all rows.
    w2 = ((gamma.astype(jnp.float32) + 1.0) * scale).reshape(1, dim)

    dtype_bytes = jnp.dtype(x.dtype).itemsize
    vmem_cap = _vmem_capacity_bytes()
    tile_rows, nsteps = _derive_tiling(rows, dim, dtype_bytes, vmem_cap)
    grid = (nsteps,)

    # Scoped-VMEM limit sized to the actual pipeline footprint (+ headroom),
    # clamped below physical capacity.
    in_blk = tile_rows * dim * dtype_bytes
    out_blk = tile_rows * dim * dtype_bytes
    w_blk = dim * 4
    need = 2 * (in_blk + out_blk + w_blk) + 2 * tile_rows * dim * 4 + (2 << 20)
    vmem_limit = int(min(max(need, 32 << 20), int(vmem_cap * 0.9)))

    cost = pl.CostEstimate(
        flops=4 * rows * dim,
        transcendentals=rows,
        bytes_accessed=2 * rows * dim * dtype_bytes + dim * 4,
    )

    # TODO(synk): for dim < 128 the output store is lane-masked; a lane-dense
    # repack (folding rows into the 128-lane axis) would recover store bandwidth.
    out2 = pl.pallas_call(
        _rmsnorm_kernel,
        out_shape=jax.ShapeDtypeStruct((rows, dim), x.dtype),
        grid_spec=pltpu.PrefetchScalarGridSpec(
            num_scalar_prefetch=0,
            grid=grid,
            in_specs=[
                pl.BlockSpec((tile_rows, dim), lambda i: (i, 0)),  # x rows tile
                pl.BlockSpec((1, dim), lambda i: (0, 0)),          # folded weight
            ],
            out_specs=pl.BlockSpec((tile_rows, dim), lambda i: (i, 0)),
        ),
        compiler_params=pltpu.CompilerParams(
            dimension_semantics=("parallel",),
            vmem_limit_bytes=vmem_limit,
        ),
        cost_estimate=cost,
    )(x2, w2)

    return out2.reshape(*lead_shape, dim)


def rmsnorm_reference(x, gamma):
    dim = x.shape[-1]
    scale = float(dim) ** 0.5
    xf = x.astype(jnp.float32)
    l2 = jnp.sqrt(jnp.sum(xf * xf, axis=-1, keepdims=True))
    denom = jnp.maximum(l2, _EPS)
    return ((xf / denom) * scale * (gamma.astype(jnp.float32) + 1.0)).astype(x.dtype)


if __name__ == "__main__":
    # Shapes implied by the module: x of shape (batch, seq, hidden), gamma of (hidden,)
    batch, seq, hidden = 2, 8, 32
    key = jax.random.PRNGKey(0)
    kx, kg = jax.random.split(key)

    x = jax.random.normal(kx, (batch, seq, hidden), dtype=jnp.float32)
    # Module init is zeros(dim); use small nonzero values so the (gamma + 1)
    # scaling path is actually exercised.
    gamma = 0.1 * jax.random.normal(kg, (hidden,), dtype=jnp.float32)

    out = rmsnorm(x, gamma)
    out = jax.block_until_ready(out)

    ref = rmsnorm_reference(x, gamma)
    assert out.shape == x.shape
    assert jnp.allclose(out, ref, atol=1e-5, rtol=1e-5), "mismatch vs reference"

    print("KERNEL_OK")
</pallas_src>

<mosaic_0001>
module attributes {stable_mosaic.version = 11 : i64} {
  func.func @_rmsnorm_kernel(%arg0: i32, %arg1: memref<16x32xf32, #tpu.memory_space<vmem>>, %arg2: memref<1x32xf32, #tpu.memory_space<vmem>>, %arg3: memref<16x32xf32, #tpu.memory_space<vmem>>) attributes {dimension_semantics = [#tpu.dimension_semantics<parallel>], iteration_bounds = array<i64: 1>, scalar_prefetch = 0 : i64, scratch_operands = 0 : i64, tpu.core_type = #tpu.core_type<tc>, window_params = [{transform_indices = @transform_0, window_bounds = array<i64: 16, 32>}, {pipeline_mode = #tpu.pipeline_mode<synchronous>, transform_indices = @transform_1, window_bounds = array<i64: 1, 32>}, {transform_indices = @transform_2, window_bounds = array<i64: 16, 32>}]} {
    %c0 = arith.constant 0 : index
    %c0_0 = arith.constant 0 : index
    %0 = vector.load %arg1[%c0, %c0_0] : memref<16x32xf32, #tpu.memory_space<vmem>>, vector<16x32xf32>
    %c0_1 = arith.constant 0 : index
    %c0_2 = arith.constant 0 : index
    %1 = vector.load %arg2[%c0_1, %c0_2] : memref<1x32xf32, #tpu.memory_space<vmem>>, vector<1x32xf32>
    %2 = arith.mulf %0, %0 : vector<16x32xf32>
    %cst = arith.constant dense<0.000000e+00> : vector<16xf32>
    %3 = vector.multi_reduction <add>, %2, %cst [1] : vector<16x32xf32> to vector<16xf32>
    %4 = vector.shape_cast %3 : vector<16xf32> to vector<16x1xf32>
    %cst_3 = arith.constant 1.000000e-24 : f32
    %5 = vector.broadcast %cst_3 : f32 to vector<16x1xf32>
    %6 = arith.maximumf %4, %5 : vector<16x1xf32>
    %7 = math.rsqrt %6 : vector<16x1xf32>
    %8 = vector.broadcast %7 : vector<16x1xf32> to vector<16x32xf32>
    %9 = arith.mulf %0, %8 : vector<16x32xf32>
    %10 = vector.broadcast %1 : vector<1x32xf32> to vector<16x32xf32>
    %11 = arith.mulf %9, %10 : vector<16x32xf32>
    %c0_4 = arith.constant 0 : index
    %c0_5 = arith.constant 0 : index
    %12 = vector.load %arg3[%c0_4, %c0_5] : memref<16x32xf32, #tpu.memory_space<vmem>>, vector<16x32xf32>
    tpu.vector_store %arg3[%c0_4, %c0_5], %11 {strides = array<i32>} : memref<16x32xf32, #tpu.memory_space<vmem>>, vector<16x32xf32>,
    return
  }
  func.func @transform_0(%arg0: i32) -> (i32, i32) {
    %c0_i32 = arith.constant 0 : i32
    %c0_i32_0 = arith.constant 0 : i32
    return %arg0, %c0_i32 : i32, i32
  }
  func.func @transform_1(%arg0: i32) -> (i32, i32) {
    %c0_i32 = arith.constant 0 : i32
    %c0_i32_0 = arith.constant 0 : i32
    %c0_i32_1 = arith.constant 0 : i32
    return %c0_i32, %c0_i32_0 : i32, i32
  }
  func.func @transform_2(%arg0: i32) -> (i32, i32) {
    %c0_i32 = arith.constant 0 : i32
    %c0_i32_0 = arith.constant 0 : i32
    return %arg0, %c0_i32 : i32, i32
  }
}

</mosaic_0001>

<bundles_post_ra>
// kernel: tpu_custom_call.1
= control target key start
LH: loop header
LB: loop body
LE: loop exit
PB: predicated region body
PF: predicated region fallthrough
CT: control target
= control target key end

     0   :  { %7 = vsyncpa [#allocation3], 0  ;;  %s162_s0 = inlined_call_operand.hbm [shape: f32[16,32], index: 0, kind: input, shape index: {}]   ;;  %s163_s1 = inlined_call_operand.vmem [shape: f32[1,32], index: 1, kind: input, shape index: {}]   ;;  %s164_s2 = inlined_call_operand.hbm [shape: f32[16,32], index: 2, kind: output, shape index: {}]  }
   0x1   :  { %8 = vsyncpa [#allocation4], 0  ;;  %s124_s9 = smov [#allocation2]  }
   0x2   :  { %s14_s10 = sshll.u32 %s124_s9, 4  ;;  %s15_s10 = int_to_ptr.vmem [resolvable:$true] %s14_s10 }
   0x3   :  { %s88_s11 = scalar_lea.vmem %s15_s10, 256  ;;  %p93_p1 = scmp.lt.s32.totalorder %s15_s10, %s15_s10 }
   0x4   :  { %p89_p0 = scmp.ne.s32.totalorder %s15_s10, %s88_s11  ;;  %p94_p2 = scmp.lt.s32.totalorder %s88_s11, %s88_s11 }
   0x6   :  { %p95_p3 = por %p94_p2, %p93_p1 }
   0x8   :  { %p96_p4 = pnand %p95_p3, %p89_p0 }
   0xa   :  { %99 = shalt.err (!%p96_p4)
}
   0xb   :  { %s125_s12 = smov 128   ;;  %s126_s13 = smov 8  }
   0xc   :  { %20 = dma.hbm_to_vmem [thread:$0]  %s162_s0, 256, %s15_s10, [#allocation3], %s125_s12, %s125_s12, %s126_s13  }
   0xd   :  { %120 = dma.done.wait [#allocation3], 256  }
   0xe   :  { %121 = vsyncadd [#allocation3], 4294967040  ;;  %v26_v0 = vld [vmem:[#allocation2] sm:$0xff]  ;;  %vm31_vm0 = vcmask 261120   ;;  %v27_v1 = vld [vmem:[#allocation2 + $0x8] sm:$0xff]  ;;  %s127_s17 = smov [#allocation5]  }
   0xf   :  { %v29_v2 = vmul.f32 %v26_v0, %v26_v0  ;;  %v30_v3 = vmul.f32 %v27_v1, %v27_v1  ;;  %v71_v11 = vld [vmem:[%s163_s1] ss:$0 sm:$0xff]  ;;  %s59_s18 = sshll.u32 %s127_s17, 4  ;;  %s60_s18 = int_to_ptr.vmem [resolvable:$true] %s59_s18 }
  0x10   :  { %s100_s19 = scalar_lea.vmem %s60_s18, 256  ;;  %p105_p6 = scmp.lt.s32.totalorder %s60_s18, %s60_s18 }
  0x11   :  { %v32_v4 = vsel %vm31_vm0, %v29_v2, 0.0  ;;  %v35_v5 = vsel %vm31_vm0, %v30_v3, 0.0  ;;  %p101_p5 = scmp.ne.s32.totalorder %s60_s18, %s100_s19  ;;  %p106_p7 = scmp.lt.s32.totalorder %s100_s19, %s100_s19 }
  0x12   :  { %33 = vadd.xlane.f32.xlu0 %v32_v4 }
  0x13   :  { %p107_p8 = por %p106_p7, %p105_p6 }
  0x15   :  { %p108_p9 = pnand %p107_p8, %p101_p5 }
  0x16   :  { %36 = vadd.xlane.f32.xlu0 %v35_v5 }
  0x9b   :  { %v34_v6 = vpop.xlane.xlu0 %33 }
  0x9c   :  { %v38_v7 = vmax.f32 %v34_v6, 1e-24 }
  0x9e   :  { %76 = vrsqrt.f32 %v38_v7 }
  0x9f   :  { %v37_v8 = vpop.xlane.xlu0 %36 }
  0xa0   :  { %v39_v9 = vmax.f32 %v37_v8, 1e-24 }
  0xa2   :  { %78 = vrsqrt.f32 %v39_v9 }
  0xab   :  { %v77_v10 = vpop.eup %76 }
  0xac   :  { %v42_v12 = vmul.f32 %v77_v10, %v26_v0 }
  0xae   :  { %v50_v13 = vmul.f32 %v71_v11, %v42_v12 }
  0xaf   :  { %v79_v14 = vpop.eup %78 }
  0xb0   :  { %v43_v15 = vmul.f32 %v79_v14, %v27_v1  ;;  %52 = vst.msk [vmem:[#allocation5] sm:$0xff] %vm31_vm0, %v50_v13 }
  0xb2   :  { %v51_v16 = vmul.f32 %v71_v11, %v43_v15 }
  0xb4   :  { %53 = vst.msk [vmem:[#allocation5 + $0x8] sm:$0xff] %vm31_vm0, %v51_v16 }
  0xb5   :  { %111 = shalt.err (!%p108_p9)
}
  0xb6   :  { %65 = dma.vmem_to_hbm [thread:$0]  %s60_s18, 256, %s164_s2, [#allocation4], %s125_s12, %s125_s12, %s126_s13  }
  0xb7   :  { %122 = dma.done.wait [#allocation4], 256  }
  0xb8   :  { %123 = vsyncadd [#allocation4], 4294967040 }
  0xb9   :  { %69 = vsyncpa [#allocation3], 1 }
  0xba   :  { %70 = vsyncpa [#allocation4], 1 }

</bundles_post_ra>
